<compile_context>
chip_gen: v6e
topology: v6e:2x2x1
jax: 0.10.0
libtpu: 0.0.40
codegen_flags: <defaults>
</compile_context>

<pallas_src>
import math
import jax
import jax.numpy as jnp
from jax.experimental import pallas as pl
from jax.experimental.pallas import tpu as pltpu


# ---------------------------------------------------------------------------
# Kernels
# ---------------------------------------------------------------------------
def _noisy_train_kernel(x_ref, wmu_ref, wsig_ref, ein_ref, eout_ref,
                        bmu_ref, bsig_ref, beps_ref, o_ref, acc_ref):
    """One (n, k) grid step of y = x @ (w_mu + w_sigma*outer(e_in,e_out)) + b."""
    k = pl.program_id(1)

    @pl.when(k == 0)
    def _():
        acc_ref[...] = jnp.zeros_like(acc_ref)

    # Noisy weight tile built on the VPU, already in (K, N) layout for the MXU.
    # (tk,1) * (1,tn) broadcast replaces the materialized weight_epsilon matrix.
    w = wmu_ref[...] + wsig_ref[...] * (ein_ref[...] * eout_ref[...])
    acc_ref[...] += jnp.dot(x_ref[...], w, preferred_element_type=jnp.float32)

    @pl.when(k == pl.num_programs(1) - 1)
    def _():
        b = bmu_ref[...] + bsig_ref[...] * beps_ref[...]          # (1, tn)
        o_ref[...] = (acc_ref[...] + b).astype(o_ref.dtype)


def _noisy_eval_kernel(x_ref, wmu_ref, bmu_ref, o_ref, acc_ref):
    """Eval fast path: plain y = x @ w_mu + b_mu (no sigma / epsilon traffic)."""
    k = pl.program_id(1)

    @pl.when(k == 0)
    def _():
        acc_ref[...] = jnp.zeros_like(acc_ref)

    acc_ref[...] += jnp.dot(x_ref[...], wmu_ref[...],
                            preferred_element_type=jnp.float32)

    @pl.when(k == pl.num_programs(1) - 1)
    def _():
        o_ref[...] = (acc_ref[...] + bmu_ref[...]).astype(o_ref.dtype)


# ---------------------------------------------------------------------------
# Wrapper
# ---------------------------------------------------------------------------
def _pick_tile(dim, max_tile=512):
    """Largest lane/MXU-friendly tile that divides `dim`; else the full dim."""
    for t in (max_tile, 256, 128):
        if dim >= t and dim % t == 0:
            return t
    return dim   # small / ragged dim: take the full extent (no tiling)


def noisy_linear_forward(x, weight_mu_t, weight_sigma_t, eps_in, eps_out,
                         bias_mu, bias_sigma, bias_epsilon=None,
                         training=True):
    """Pallas implementation of NoisyLinear.forward.

    x:               (B, in_f)      float32
    weight_mu_t:     (in_f, out_f)  weight_mu stored transposed (K, N layout)
    weight_sigma_t:  (in_f, out_f)
    eps_in:          (in_f,)        factorized-noise row factor
    eps_out:         (out_f,)       factorized-noise col factor (== bias_epsilon)
    bias_mu/sigma:   (out_f,)
    Returns:         (B, out_f)
    """
    B, in_f = x.shape
    out_f = weight_mu_t.shape[1]
    if bias_epsilon is None:
        bias_epsilon = eps_out

    tk = _pick_tile(in_f)
    tn = _pick_tile(out_f)
    grid = (out_f // tn, in_f // tk)            # reduction (K) axis last

    cparams = pltpu.CompilerParams(
        dimension_semantics=("parallel", "arbitrary"),
        vmem_limit_bytes=32 * 1024 * 1024)

    out_shape = jax.ShapeDtypeStruct((B, out_f), x.dtype)
    x_spec      = pl.BlockSpec((B, tk),  lambda n, k: (0, k))
    w_spec      = pl.BlockSpec((tk, tn), lambda n, k: (k, n))
    colvec_spec = pl.BlockSpec((tk, 1),  lambda n, k: (k, 0))
    rowvec_spec = pl.BlockSpec((1, tn),  lambda n, k: (0, n))
    out_spec    = pl.BlockSpec((B, tn),  lambda n, k: (0, n))
    scratch = [pltpu.VMEM((B, tn), jnp.float32)]

    if training:
        return pl.pallas_call(
            _noisy_train_kernel,
            out_shape=out_shape,
            grid_spec=pltpu.PrefetchScalarGridSpec(
                num_scalar_prefetch=0,
                grid=grid,
                in_specs=[x_spec, w_spec, w_spec, colvec_spec, rowvec_spec,
                          rowvec_spec, rowvec_spec, rowvec_spec],
                out_specs=out_spec,
                scratch_shapes=scratch),
            compiler_params=cparams,
        )(x, weight_mu_t, weight_sigma_t,
          eps_in.reshape(in_f, 1), eps_out.reshape(1, out_f),
          bias_mu.reshape(1, out_f), bias_sigma.reshape(1, out_f),
          bias_epsilon.reshape(1, out_f))

    # Eval fast path: only mu weights / bias ever leave HBM.
    return pl.pallas_call(
        _noisy_eval_kernel,
        out_shape=out_shape,
        grid_spec=pltpu.PrefetchScalarGridSpec(
            num_scalar_prefetch=0,
            grid=grid,
            in_specs=[x_spec, w_spec, rowvec_spec],
            out_specs=out_spec,
            scratch_shapes=scratch),
        compiler_params=cparams,
    )(x, weight_mu_t, bias_mu.reshape(1, out_f))


# ---------------------------------------------------------------------------
# Parameter / noise init (plain JAX — mirrors reset_parameters / reset_noise)
# ---------------------------------------------------------------------------
def _scale_noise(key, size):
    """sign(x) * sqrt(|x|) for x ~ N(0, 1)  (factorized Gaussian noise)."""
    x = jax.random.normal(key, (size,), dtype=jnp.float32)
    return jnp.sign(x) * jnp.sqrt(jnp.abs(x))


def init_noisy_linear(key, in_features, out_features, std_init=0.5):
    """Weights stored in (in, out) layout; noise kept factorized (no outer())."""
    k_wmu, k_bmu, k_ein, k_eout = jax.random.split(key, 4)
    mu_range = 1.0 / math.sqrt(in_features)

    weight_mu_t = jax.random.uniform(
        k_wmu, (in_features, out_features), jnp.float32, -mu_range, mu_range)
    weight_sigma_t = jnp.full((in_features, out_features),
                              std_init / math.sqrt(in_features), jnp.float32)
    bias_mu = jax.random.uniform(
        k_bmu, (out_features,), jnp.float32, -mu_range, mu_range)
    bias_sigma = jnp.full((out_features,),
                          std_init / math.sqrt(out_features), jnp.float32)

    # reset_noise(): only the factor vectors are stored; the kernel forms the
    # outer product on the fly (weight_epsilon never hits HBM).
    eps_in = _scale_noise(k_ein, in_features)
    eps_out = _scale_noise(k_eout, out_features)     # == bias_epsilon

    return dict(weight_mu_t=weight_mu_t, weight_sigma_t=weight_sigma_t,
                bias_mu=bias_mu, bias_sigma=bias_sigma,
                eps_in=eps_in, eps_out=eps_out)


if __name__ == "__main__":
    key = jax.random.PRNGKey(0)
    k_params, k_x = jax.random.split(key)

    batch, in_features, out_features = 8, 256, 128
    params = init_noisy_linear(k_params, in_features, out_features, std_init=0.5)
    x = jax.random.normal(k_x, (batch, in_features), dtype=jnp.float32)

    # training=True path (noisy weights)
    out_train = noisy_linear_forward(
        x, params["weight_mu_t"], params["weight_sigma_t"],
        params["eps_in"], params["eps_out"],
        params["bias_mu"], params["bias_sigma"], training=True)

    # training=False fast path (mu-only)
    out_eval = noisy_linear_forward(
        x, params["weight_mu_t"], params["weight_sigma_t"],
        params["eps_in"], params["eps_out"],
        params["bias_mu"], params["bias_sigma"], training=False)

    jax.block_until_ready((out_train, out_eval))

    # Pure-JAX references (same semantics as the PyTorch module's forward).
    w_noisy = (params["weight_mu_t"]
               + params["weight_sigma_t"]
               * (params["eps_in"][:, None] * params["eps_out"][None, :]))
    b_noisy = params["bias_mu"] + params["bias_sigma"] * params["eps_out"]
    ref_train = x @ w_noisy + b_noisy
    ref_eval = x @ params["weight_mu_t"] + params["bias_mu"]

    assert out_train.shape == (batch, out_features)
    assert jnp.allclose(out_train, ref_train, atol=1e-5, rtol=1e-5)
    assert jnp.allclose(out_eval, ref_eval, atol=1e-5, rtol=1e-5)

    print("KERNEL_OK")
</pallas_src>

<mosaic_0001>
module attributes {stable_mosaic.version = 11 : i64} {
  func.func @_noisy_train_kernel(%arg0: i32, %arg1: i32, %arg2: memref<8x256xf32, #tpu.memory_space<vmem>>, %arg3: memref<256x128xf32, #tpu.memory_space<vmem>>, %arg4: memref<256x128xf32, #tpu.memory_space<vmem>>, %arg5: memref<256x1xf32, #tpu.memory_space<vmem>>, %arg6: memref<1x128xf32, #tpu.memory_space<vmem>>, %arg7: memref<1x128xf32, #tpu.memory_space<vmem>>, %arg8: memref<1x128xf32, #tpu.memory_space<vmem>>, %arg9: memref<1x128xf32, #tpu.memory_space<vmem>>, %arg10: memref<8x128xf32, #tpu.memory_space<vmem>>, %arg11: memref<8x128xf32, #tpu.memory_space<vmem>>) attributes {dimension_semantics = [#tpu.dimension_semantics<parallel>, #tpu.dimension_semantics<arbitrary>], iteration_bounds = array<i64: 1, 1>, scalar_prefetch = 0 : i64, scratch_operands = 1 : i64, tpu.core_type = #tpu.core_type<tc>, window_params = [{transform_indices = @transform_0, window_bounds = array<i64: 8, 256>}, {transform_indices = @transform_1, window_bounds = array<i64: 256, 128>}, {transform_indices = @transform_2, window_bounds = array<i64: 256, 128>}, {transform_indices = @transform_3, window_bounds = array<i64: 256, 1>}, {transform_indices = @transform_4, window_bounds = array<i64: 1, 128>}, {transform_indices = @transform_5, window_bounds = array<i64: 1, 128>}, {transform_indices = @transform_6, window_bounds = array<i64: 1, 128>}, {transform_indices = @transform_7, window_bounds = array<i64: 1, 128>}, {transform_indices = @transform_8, window_bounds = array<i64: 8, 128>}]} {
    %c0_i32 = arith.constant 0 : i32
    %0 = arith.cmpi eq, %arg1, %c0_i32 : i32
    %1 = arith.extui %0 : i1 to i32
    %c0_i32_0 = arith.constant 0 : i32
    %2 = arith.cmpi ne, %1, %c0_i32_0 : i32
    scf.if %2 {
      %cst_16 = arith.constant 0.000000e+00 : f32
      %20 = vector.broadcast %cst_16 : f32 to vector<8x128xf32>
      %c0_17 = arith.constant 0 : index
      %c0_18 = arith.constant 0 : index
      %21 = vector.load %arg11[%c0_17, %c0_18] : memref<8x128xf32, #tpu.memory_space<vmem>>, vector<8x128xf32>
      tpu.vector_store %arg11[%c0_17, %c0_18], %20 {strides = array<i32>} : memref<8x128xf32, #tpu.memory_space<vmem>>, vector<8x128xf32>,
    } else {
    }
    %c0 = arith.constant 0 : index
    %c0_1 = arith.constant 0 : index
    %3 = vector.load %arg3[%c0, %c0_1] : memref<256x128xf32, #tpu.memory_space<vmem>>, vector<256x128xf32>
    %c0_2 = arith.constant 0 : index
    %c0_3 = arith.constant 0 : index
    %4 = vector.load %arg4[%c0_2, %c0_3] : memref<256x128xf32, #tpu.memory_space<vmem>>, vector<256x128xf32>
    %c0_4 = arith.constant 0 : index
    %c0_5 = arith.constant 0 : index
    %5 = vector.load %arg5[%c0_4, %c0_5] : memref<256x1xf32, #tpu.memory_space<vmem>>, vector<256x1xf32>
    %c0_6 = arith.constant 0 : index
    %c0_7 = arith.constant 0 : index
    %6 = vector.load %arg6[%c0_6, %c0_7] : memref<1x128xf32, #tpu.memory_space<vmem>>, vector<1x128xf32>
    %7 = vector.broadcast %5 : vector<256x1xf32> to vector<256x128xf32>
    %8 = vector.broadcast %6 : vector<1x128xf32> to vector<256x128xf32>
    %9 = arith.mulf %7, %8 : vector<256x128xf32>
    %10 = arith.mulf %4, %9 : vector<256x128xf32>
    %11 = arith.addf %3, %10 : vector<256x128xf32>
    %c0_8 = arith.constant 0 : index
    %c0_9 = arith.constant 0 : index
    %12 = vector.load %arg11[%c0_8, %c0_9] : memref<8x128xf32, #tpu.memory_space<vmem>>, vector<8x128xf32>
    %c0_10 = arith.constant 0 : index
    %c0_11 = arith.constant 0 : index
    %13 = vector.load %arg2[%c0_10, %c0_11] : memref<8x256xf32, #tpu.memory_space<vmem>>, vector<8x256xf32>
    %cst = arith.constant dense<0.000000e+00> : vector<8x128xf32>
    %14 = tpu.matmul %13, %11, %cst {dimension_numbers = #tpu.dot_dimension_numbers<[1], [0], [0], [1], [0, 0, 1, 1], [], []>} : vector<8x256xf32>, vector<256x128xf32>, vector<8x128xf32> -> vector<8x128xf32>
    %15 = arith.addf %12, %14 : vector<8x128xf32>
    %c0_12 = arith.constant 0 : index
    %c0_13 = arith.constant 0 : index
    %16 = vector.load %arg11[%c0_12, %c0_13] : memref<8x128xf32, #tpu.memory_space<vmem>>, vector<8x128xf32>
    tpu.vector_store %arg11[%c0_12, %c0_13], %15 {strides = array<i32>} : memref<8x128xf32, #tpu.memory_space<vmem>>, vector<8x128xf32>,
    %c0_i32_14 = arith.constant 0 : i32
    %17 = arith.cmpi eq, %arg1, %c0_i32_14 : i32
    %18 = arith.extui %17 : i1 to i32
    %c0_i32_15 = arith.constant 0 : i32
    %19 = arith.cmpi ne, %18, %c0_i32_15 : i32
    scf.if %19 {
      %c0_16 = arith.constant 0 : index
      %c0_17 = arith.constant 0 : index
      %20 = vector.load %arg7[%c0_16, %c0_17] : memref<1x128xf32, #tpu.memory_space<vmem>>, vector<1x128xf32>
      %c0_18 = arith.constant 0 : index
      %c0_19 = arith.constant 0 : index
      %21 = vector.load %arg8[%c0_18, %c0_19] : memref<1x128xf32, #tpu.memory_space<vmem>>, vector<1x128xf32>
      %c0_20 = arith.constant 0 : index
      %c0_21 = arith.constant 0 : index
      %22 = vector.load %arg9[%c0_20, %c0_21] : memref<1x128xf32, #tpu.memory_space<vmem>>, vector<1x128xf32>
      %23 = arith.mulf %21, %22 : vector<1x128xf32>
      %24 = arith.addf %20, %23 : vector<1x128xf32>
      %c0_22 = arith.constant 0 : index
      %c0_23 = arith.constant 0 : index
      %25 = vector.load %arg11[%c0_22, %c0_23] : memref<8x128xf32, #tpu.memory_space<vmem>>, vector<8x128xf32>
      %26 = vector.broadcast %24 : vector<1x128xf32> to vector<8x128xf32>
      %27 = arith.addf %25, %26 : vector<8x128xf32>
      %c0_24 = arith.constant 0 : index
      %c0_25 = arith.constant 0 : index
      %28 = vector.load %arg10[%c0_24, %c0_25] : memref<8x128xf32, #tpu.memory_space<vmem>>, vector<8x128xf32>
      tpu.vector_store %arg10[%c0_24, %c0_25], %27 {strides = array<i32>} : memref<8x128xf32, #tpu.memory_space<vmem>>, vector<8x128xf32>,
    } else {
    }
    return
  }
  func.func @transform_0(%arg0: i32, %arg1: i32) -> (i32, i32) {
    %c0_i32 = arith.constant 0 : i32
    %c0_i32_0 = arith.constant 0 : i32
    return %c0_i32, %arg1 : i32, i32
  }
  func.func @transform_1(%arg0: i32, %arg1: i32) -> (i32, i32) {
    %c0_i32 = arith.constant 0 : i32
    return %arg1, %arg0 : i32, i32
  }
  func.func @transform_2(%arg0: i32, %arg1: i32) -> (i32, i32) {
    %c0_i32 = arith.constant 0 : i32
    return %arg1, %arg0 : i32, i32
  }
  func.func @transform_3(%arg0: i32, %arg1: i32) -> (i32, i32) {
    %c0_i32 = arith.constant 0 : i32
    %c0_i32_0 = arith.constant 0 : i32
    return %arg1, %c0_i32 : i32, i32
  }
  func.func @transform_4(%arg0: i32, %arg1: i32) -> (i32, i32) {
    %c0_i32 = arith.constant 0 : i32
    %c0_i32_0 = arith.constant 0 : i32
    return %c0_i32, %arg0 : i32, i32
  }
  func.func @transform_5(%arg0: i32, %arg1: i32) -> (i32, i32) {
    %c0_i32 = arith.constant 0 : i32
    %c0_i32_0 = arith.constant 0 : i32
    return %c0_i32, %arg0 : i32, i32
  }
  func.func @transform_6(%arg0: i32, %arg1: i32) -> (i32, i32) {
    %c0_i32 = arith.constant 0 : i32
    %c0_i32_0 = arith.constant 0 : i32
    return %c0_i32, %arg0 : i32, i32
  }
  func.func @transform_7(%arg0: i32, %arg1: i32) -> (i32, i32) {
    %c0_i32 = arith.constant 0 : i32
    %c0_i32_0 = arith.constant 0 : i32
    return %c0_i32, %arg0 : i32, i32
  }
  func.func @transform_8(%arg0: i32, %arg1: i32) -> (i32, i32) {
    %c0_i32 = arith.constant 0 : i32
    %c0_i32_0 = arith.constant 0 : i32
    return %c0_i32, %arg0 : i32, i32
  }
}

</mosaic_0001>

<bundles_post_ra>
// kernel: tpu_custom_call.1
= control target key start
LH: loop header
LB: loop body
LE: loop exit
PB: predicated region body
PF: predicated region fallthrough
CT: control target
= control target key end

     0   :  { %13 = vsyncpa [#allocation4], 0  ;;  %s936_s0 = inlined_call_operand.hbm [shape: f32[8,256], index: 0, kind: input, shape index: {}]   ;;  %s937_s1 = inlined_call_operand.vmem [shape: f32[256,128], index: 1, kind: input, shape index: {}]   ;;  %s938_s2 = inlined_call_operand.hbm [shape: f32[256,128], index: 2, kind: input, shape index: {}]   ;;  %s939_s3 = inlined_call_operand.vmem [shape: f32[256,1], index: 3, kind: input, shape index: {}]   ;;  %s940_s4 = inlined_call_operand.vmem [shape: f32[1,128], index: 4, kind: input, shape index: {}]   ;;  %s941_s5 = inlined_call_operand.vmem [shape: f32[1,128], index: 5, kind: input, shape index: {}]   ;;  %s942_s6 = inlined_call_operand.vmem [shape: f32[1,128], index: 6, kind: input, shape index: {}]   ;;  %s943_s7 = inlined_call_operand.vmem [shape: f32[1,128], index: 7, kind: input, shape index: {}]   ;;  %s944_s8 = inlined_call_operand.hbm [shape: f32[8,128], index: 8, kind: output, shape index: {}]  }
   0x1   :  { %14 = vsyncpa [#allocation7], 0 }
   0x2   :  { %15 = vsyncpa [#allocation5], 0  ;;  %s638_s27 = smov [#allocation3]   ;;  %s639_s29 = smov [#allocation6]  }
   0x3   :  { %s22_s28 = sshll.u32 %s638_s27, 4  ;;  %s33_s30 = sshll.u32 %s639_s29, 4  ;;  %s23_s28 = int_to_ptr.vmem [resolvable:$true] %s22_s28  ;;  %s34_s30 = int_to_ptr.vmem [resolvable:$true] %s33_s30 }
   0x4   :  { %s580_s9 = scalar_lea.vmem %s23_s28, 256  ;;  %p585_p1 = scmp.lt.s32.totalorder %s23_s28, %s23_s28 }
   0x5   :  { %p581_p0 = scmp.ne.s32.totalorder %s23_s28, %s580_s9  ;;  %p586_p2 = scmp.lt.s32.totalorder %s580_s9, %s580_s9 }
   0x7   :  { %p587_p3 = por %p586_p2, %p585_p1 }
   0x9   :  { %p588_p4 = pnand %p587_p3, %p581_p0 }
   0xb   :  { %591 = shalt.err (!%p588_p4)
}
   0xc   :  { %25 = dma.hbm_to_vmem [thread:$0]  %s936_s0, 256, %s23_s28, [#allocation4]  }
   0xd   :  { %s600_s12 = scalar_lea.vmem %s34_s30, 4096  ;;  %p605_p6 = scmp.lt.s32.totalorder %s34_s30, %s34_s30 }
   0xe   :  { %p601_p5 = scmp.ne.s32.totalorder %s34_s30, %s600_s12  ;;  %p606_p7 = scmp.lt.s32.totalorder %s600_s12, %s600_s12 }
  0x10   :  { %p607_p8 = por %p606_p7, %p605_p6 }
  0x12   :  { %p608_p9 = pnand %p607_p8, %p601_p5 }
  0x14   :  { %611 = shalt.err (!%p608_p9)
}
  0x15   :  { %s640_s13 = smov 128   ;;  %s641_s14 = smov 8  }
  0x16   :  { %39 = dma.hbm_to_vmem [thread:$0]  %s938_s2, 4096, %s34_s30, [#allocation7], %s640_s13, %s640_s13, %s641_s14  }
  0x17   :  { %632 = dma.done.wait [#allocation4], 256  }
  0x18   :  { %633 = vsyncadd [#allocation4], 4294967040 }
  0x19   :  { %634 = dma.done.wait [#allocation7], 4096  }
  0x1a   :  { %635 = vsyncadd [#allocation7], 4294963200  ;;  %v642_v0 = vmov 0   ;;  %v156_v1 = vld [vmem:[%s939_s3 + $0xf8] sm:$0xff]  ;;  %v155_v2 = vld [vmem:[%s939_s3 + $0xf0] sm:$0xff]  ;;  %s643_s24 = smov [#allocation8]  }
  0x1b   :  { %571 = vset.pattern.permute.xlu1 %v642_v0  ;;  %570 = vset.pattern.permute.xlu0 %v642_v0  ;;  %v140_v3 = vld [vmem:[%s939_s3 + $0x78] sm:$0xff]  ;;  %v139_v4 = vld [vmem:[%s939_s3 + $0x70] sm:$0xff]  ;;  %v154_v5 = vld [vmem:[%s939_s3 + $0xe8] sm:$0xff]  ;;  %s518_s25 = sshll.u32 %s643_s24, 4  ;;  %s519_s25 = int_to_ptr.vmem [resolvable:$true] %s518_s25 }
  0x1c   :  { %315 = vperm.xlu0 %570, %v156_v1   ;;  %310 = vperm.xlu1 %571, %v155_v2   ;;  %v138_v6 = vld [vmem:[%s939_s3 + $0x68] sm:$0xff]  ;;  %v153_v7 = vld [vmem:[%s939_s3 + $0xe0] sm:$0xff]  ;;  %v152_v9 = vld [vmem:[%s939_s3 + $0xd8] sm:$0xff]  ;;  %p617_p11 = scmp.lt.s32.totalorder %s519_s25, %s519_s25 }
  0x1d   :  { %v137_v8 = vld [vmem:[%s939_s3 + $0x60] sm:$0xff]  ;;  %v136_v10 = vld [vmem:[%s939_s3 + $0x58] sm:$0xff]  ;;  %v151_v11 = vld [vmem:[%s939_s3 + $0xd0] sm:$0xff] }
  0x1e   :  { %v135_v12 = vld [vmem:[%s939_s3 + $0x50] sm:$0xff]  ;;  %v150_v13 = vld [vmem:[%s939_s3 + $0xc8] sm:$0xff]  ;;  %v149_v15 = vld [vmem:[%s939_s3 + $0xc0] sm:$0xff] }
  0x1f   :  { %v134_v14 = vld [vmem:[%s939_s3 + $0x48] sm:$0xff]  ;;  %v133_v16 = vld [vmem:[%s939_s3 + $0x40] sm:$0xff]  ;;  %v148_v17 = vld [vmem:[%s939_s3 + $0xb8] sm:$0xff] }
  0x20   :  { %235 = vperm.xlu0 %570, %v140_v3   ;;  %230 = vperm.xlu1 %571, %v139_v4   ;;  %v132_v18 = vld [vmem:[%s939_s3 + $0x38] sm:$0xff]  ;;  %v147_v19 = vld [vmem:[%s939_s3 + $0xb0] sm:$0xff]  ;;  %v146_v21 = vld [vmem:[%s939_s3 + $0xa8] sm:$0xff] }
  0x21   :  { %v131_v20 = vld [vmem:[%s939_s3 + $0x30] sm:$0xff]  ;;  %v130_v22 = vld [vmem:[%s939_s3 + $0x28] sm:$0xff]  ;;  %v145_v23 = vld [vmem:[%s939_s3 + $0xa0] sm:$0xff] }
  0x22   :  { %v129_v24 = vld [vmem:[%s939_s3 + $0x20] sm:$0xff]  ;;  %v144_v25 = vld [vmem:[%s939_s3 + $0x98] sm:$0xff]  ;;  %v143_v27 = vld [vmem:[%s939_s3 + $0x90] sm:$0xff] }
  0x23   :  { %v128_v26 = vld [vmem:[%s939_s3 + $0x18] sm:$0xff]  ;;  %v127_v28 = vld [vmem:[%s939_s3 + $0x10] sm:$0xff]  ;;  %v142_v29 = vld [vmem:[%s939_s3 + $0x88] sm:$0xff] }
  0x24   :  { %305 = vperm.xlu0 %570, %v154_v5   ;;  %225 = vperm.xlu1 %571, %v138_v6   ;;  %v126_v30 = vld [vmem:[%s939_s3 + $0x8] sm:$0xff]  ;;  %v141_v31 = vld [vmem:[%s939_s3 + $0x80] sm:$0xff]  ;;  %v92_v40 = vld [vmem:[%s937_s1 + $0xf8] sm:$0xff] }
  0x25   :  { %v125_v32 = vld [vmem:[%s939_s3] sm:$0xff]  ;;  %v422_v33 = vld [vmem:[#allocation3 + $0x8] sm:$0xff]  ;;  %v76_v51 = vld [vmem:[%s937_s1 + $0x78] sm:$0xff] }
  0x26   :  { %487 = vmatprep.mubr.f32.mxu0 %v422_v33  ;;  %v794_v34 = vld [vmem:[%s940_s4] ss:$0 sm:$0xff]  ;;  %v124_v37 = vld [vmem:[#allocation6 + $0xf8] sm:$0xff]  ;;  %v91_v54 = vld [vmem:[%s937_s1 + $0xf0] sm:$0xff] }
  0x27   :  { %v123_v41 = vld [vmem:[#allocation6 + $0xf0] sm:$0xff]  ;;  %v108_v44 = vld [vmem:[#allocation6 + $0x78] sm:$0xff]  ;;  %v122_v56 = vld [vmem:[#allocation6 + $0xe8] sm:$0xff] }
  0x28   :  { %300 = vperm.xlu0 %570, %v153_v7   ;;  %220 = vperm.xlu1 %571, %v137_v8   ;;  %v107_v46 = vld [vmem:[#allocation6 + $0x70] sm:$0xff]  ;;  %v106_v58 = vld [vmem:[#allocation6 + $0x68] sm:$0xff]  ;;  %v75_v59 = vld [vmem:[%s937_s1 + $0x70] sm:$0xff] }
  0x29   :  { %v90_v0 = vld [vmem:[%s937_s1 + $0xe8] sm:$0xff]  ;;  %v121_v6 = vld [vmem:[#allocation6 + $0xe0] sm:$0xff] }
  0x2a   :  { %v74_v1 = vld [vmem:[%s937_s1 + $0x68] sm:$0xff]  ;;  %v105_v8 = vld [vmem:[#allocation6 + $0x60] sm:$0xff] }
  0x2c   :  { %295 = vperm.xlu0 %570, %v152_v9   ;;  %215 = vperm.xlu1 %571, %v136_v10  }
  0x30   :  { %290 = vperm.xlu0 %570, %v151_v11   ;;  %210 = vperm.xlu1 %571, %v135_v12  }
  0x34   :  { %285 = vperm.xlu0 %570, %v150_v13   ;;  %205 = vperm.xlu1 %571, %v134_v14   ;;  %v89_v13 = vld [vmem:[%s937_s1 + $0xe0] sm:$0xff] }
  0x35   :  { %v73_v14 = vld [vmem:[%s937_s1 + $0x60] sm:$0xff] }
  0x38   :  { %280 = vperm.xlu0 %570, %v149_v15   ;;  %200 = vperm.xlu1 %571, %v133_v16  }
  0x3c   :  { %275 = vperm.xlu0 %570, %v148_v17   ;;  %195 = vperm.xlu1 %571, %v132_v18   ;;  %v120_v18 = vld [vmem:[#allocation6 + $0xd8] sm:$0xff] }
  0x40   :  { %270 = vperm.xlu0 %570, %v147_v19   ;;  %190 = vperm.xlu1 %571, %v131_v20   ;;  %v104_v20 = vld [vmem:[#allocation6 + $0x58] sm:$0xff] }
  0x44   :  { %265 = vperm.xlu0 %570, %v146_v21   ;;  %185 = vperm.xlu1 %571, %v130_v22  }
  0x48   :  { %260 = vperm.xlu0 %570, %v145_v23   ;;  %180 = vperm.xlu1 %571, %v129_v24  }
  0x4c   :  { %255 = vperm.xlu0 %570, %v144_v25   ;;  %175 = vperm.xlu1 %571, %v128_v26   ;;  %v88_v25 = vld [vmem:[%s937_s1 + $0xd8] sm:$0xff] }
  0x4d   :  { %v72_v26 = vld [vmem:[%s937_s1 + $0x58] sm:$0xff] }
  0x50   :  { %250 = vperm.xlu0 %570, %v143_v27   ;;  %170 = vperm.xlu1 %571, %v127_v28  }
  0x54   :  { %245 = vperm.xlu0 %570, %v142_v29   ;;  %165 = vperm.xlu1 %571, %v126_v30   ;;  %v119_v30 = vld [vmem:[#allocation6 + $0xd0] sm:$0xff] }
  0x58   :  { %240 = vperm.xlu0 %570, %v141_v31   ;;  %160 = vperm.xlu1 %571, %v125_v32   ;;  %v103_v32 = vld [vmem:[#allocation6 + $0x50] sm:$0xff] }
  0x97   :  { %v316_v35 = vpop.permute.xlu0 %315  ;;  %v311_v36 = vpop.permute.xlu1 %310 }
  0x98   :  { %v355_v38 = vmul.f32 %v794_v34, %v316_v35  ;;  %v354_v39 = vmul.f32 %v794_v34, %v311_v36 }
  0x9a   :  { %v387_v42 = vmul.f32 %v355_v38, %v124_v37  ;;  %v386_v50 = vmul.f32 %v354_v39, %v123_v41  ;;  %v87_v38 = vld [vmem:[%s937_s1 + $0xd0] sm:$0xff] }
  0x9b   :  { %v236_v43 = vpop.permute.xlu0 %235  ;;  %v231_v45 = vpop.permute.xlu1 %230  ;;  %v71_v39 = vld [vmem:[%s937_s1 + $0x50] sm:$0xff] }
  0x9c   :  { %v339_v47 = vmul.f32 %v794_v34, %v236_v43  ;;  %v338_v48 = vmul.f32 %v794_v34, %v231_v45  ;;  %v419_v49 = vadd.f32 %v387_v42, %v92_v40  ;;  %v418_v63 = vadd.f32 %v386_v50, %v91_v54  ;;  %v118_v43 = vld [vmem:[#allocation6 + $0xc8] sm:$0xff]  ;;  %v86_v50 = vld [vmem:[%s937_s1 + $0xc8] sm:$0xff] }
  0x9d   :  { %v102_v45 = vld [vmem:[#allocation6 + $0x48] sm:$0xff] }
  0x9e   :  { %v371_v52 = vmul.f32 %v339_v47, %v108_v44  ;;  %v370_v53 = vmul.f32 %v338_v48, %v107_v46  ;;  %529 = vmatprep.subr.mxu0 %v419_v49 }
  0x9f   :  { %v306_v55 = vpop.permute.xlu0 %305  ;;  %v226_v57 = vpop.permute.xlu1 %225 }
  0xa0   :  { %v353_v60 = vmul.f32 %v794_v34, %v306_v55  ;;  %v337_v61 = vmul.f32 %v794_v34, %v226_v57  ;;  %v403_v62 = vadd.f32 %v371_v52, %v76_v51  ;;  %v402_v4 = vadd.f32 %v370_v53, %v75_v59  ;;  %v70_v51 = vld [vmem:[%s937_s1 + $0x48] sm:$0xff]  ;;  %v117_v55 = vld [vmem:[#allocation6 + $0xc0] sm:$0xff] }
  0xa1   :  { %v101_v57 = vld [vmem:[#allocation6 + $0x40] sm:$0xff] }
  0xa2   :  { %v385_v2 = vmul.f32 %v353_v60, %v122_v56  ;;  %v369_v3 = vmul.f32 %v337_v61, %v106_v58  ;;  %530 = vmatpush3.msra.mxu0 %v403_v62  ;;  %v85_v62 = vld [vmem:[%s937_s1 + $0xc0] sm:$0xff] }
  0xa3   :  { %v301_v5 = vpop.permute.xlu0 %300  ;;  %v221_v7 = vpop.permute.xlu1 %220  ;;  %531 = vmatprep.subr.mxu0 %v418_v63  ;;  %v69_v63 = vld [vmem:[%s937_s1 + $0x40] sm:$0xff] }
  0xa4   :  { %v352_v9 = vmul.f32 %v794_v34, %v301_v5  ;;  %v336_v10 = vmul.f32 %v794_v34, %v221_v7  ;;  %532 = vmatpush3.msra.mxu0 %v402_v4  ;;  %v417_v11 = vadd.f32 %v385_v2, %v90_v0  ;;  %v401_v12 = vadd.f32 %v369_v3, %v74_v1  ;;  %v116_v3 = vld [vmem:[#allocation6 + $0xb8] sm:$0xff] }
  0xa5   :  { %v100_v5 = vld [vmem:[#allocation6 + $0x38] sm:$0xff] }
  0xa6   :  { %v384_v15 = vmul.f32 %v352_v9, %v121_v6  ;;  %v368_v16 = vmul.f32 %v336_v10, %v105_v8  ;;  %533 = vmatprep.subr.mxu0 %v417_v11  ;;  %v84_v10 = vld [vmem:[%s937_s1 + $0xb8] sm:$0xff] }
  0xa7   :  { %v296_v17 = vpop.permute.xlu0 %295  ;;  %v216_v19 = vpop.permute.xlu1 %215  ;;  %534 = vmatpush3.msra.mxu0 %v401_v12  ;;  %v68_v11 = vld [vmem:[%s937_s1 + $0x38] sm:$0xff] }
  0xa8   :  { %v351_v21 = vmul.f32 %v794_v34, %v296_v17  ;;  %v335_v22 = vmul.f32 %v794_v34, %v216_v19  ;;  %v416_v23 = vadd.f32 %v384_v15, %v89_v13  ;;  %v400_v24 = vadd.f32 %v368_v16, %v73_v14  ;;  %v115_v15 = vld [vmem:[#allocation6 + $0xb0] sm:$0xff] }
  0xa9   :  { %v99_v17 = vld [vmem:[#allocation6 + $0x30] sm:$0xff] }
  0xaa   :  { %v383_v27 = vmul.f32 %v351_v21, %v120_v18  ;;  %v367_v28 = vmul.f32 %v335_v22, %v104_v20  ;;  %535 = vmatprep.subr.mxu0 %v416_v23  ;;  %v83_v22 = vld [vmem:[%s937_s1 + $0xb0] sm:$0xff] }
  0xab   :  { %v291_v29 = vpop.permute.xlu0 %290  ;;  %v211_v31 = vpop.permute.xlu1 %210  ;;  %536 = vmatpush3.msra.mxu0 %v400_v24  ;;  %v67_v23 = vld [vmem:[%s937_s1 + $0x30] sm:$0xff] }
  0xac   :  { %v350_v33 = vmul.f32 %v794_v34, %v291_v29  ;;  %v334_v35 = vmul.f32 %v794_v34, %v211_v31  ;;  %v415_v36 = vadd.f32 %v383_v27, %v88_v25  ;;  %v399_v37 = vadd.f32 %v367_v28, %v72_v26  ;;  %v114_v27 = vld [vmem:[#allocation6 + $0xa8] sm:$0xff] }
  0xad   :  { %v98_v29 = vld [vmem:[#allocation6 + $0x28] sm:$0xff] }
  0xae   :  { %v382_v40 = vmul.f32 %v350_v33, %v119_v30  ;;  %v366_v41 = vmul.f32 %v334_v35, %v103_v32  ;;  %537 = vmatprep.subr.mxu0 %v415_v36  ;;  %v82_v35 = vld [vmem:[%s937_s1 + $0xa8] sm:$0xff] }
  0xaf   :  { %v286_v42 = vpop.permute.xlu0 %285  ;;  %v206_v44 = vpop.permute.xlu1 %205  ;;  %538 = vmatpush3.msra.mxu0 %v399_v37  ;;  %v66_v36 = vld [vmem:[%s937_s1 + $0x28] sm:$0xff] }
  0xb0   :  { %v349_v46 = vmul.f32 %v794_v34, %v286_v42  ;;  %v333_v47 = vmul.f32 %v794_v34, %v206_v44  ;;  %v414_v48 = vadd.f32 %v382_v40, %v87_v38  ;;  %v398_v49 = vadd.f32 %v366_v41, %v71_v39  ;;  %v113_v40 = vld [vmem:[#allocation6 + $0xa0] sm:$0xff] }
  0xb1   :  { %v97_v42 = vld [vmem:[#allocation6 + $0x20] sm:$0xff] }
  0xb2   :  { %v381_v52 = vmul.f32 %v349_v46, %v118_v43  ;;  %v365_v53 = vmul.f32 %v333_v47, %v102_v45  ;;  %539 = vmatprep.subr.mxu0 %v414_v48  ;;  %v81_v47 = vld [vmem:[%s937_s1 + $0xa0] sm:$0xff] }
  0xb3   :  { %v281_v54 = vpop.permute.xlu0 %280  ;;  %v201_v56 = vpop.permute.xlu1 %200  ;;  %540 = vmatpush3.msra.mxu0 %v398_v49  ;;  %v65_v48 = vld [vmem:[%s937_s1 + $0x20] sm:$0xff] }
  0xb4   :  { %v348_v58 = vmul.f32 %v794_v34, %v281_v54  ;;  %v332_v59 = vmul.f32 %v794_v34, %v201_v56  ;;  %v413_v60 = vadd.f32 %v381_v52, %v86_v50  ;;  %v397_v61 = vadd.f32 %v365_v53, %v70_v51  ;;  %v112_v52 = vld [vmem:[#allocation6 + $0x98] sm:$0xff] }
  0xb5   :  { %v96_v54 = vld [vmem:[#allocation6 + $0x18] sm:$0xff] }
  0xb6   :  { %v380_v0 = vmul.f32 %v348_v58, %v117_v55  ;;  %v364_v1 = vmul.f32 %v332_v59, %v101_v57  ;;  %541 = vmatprep.subr.mxu0 %v413_v60  ;;  %v80_v59 = vld [vmem:[%s937_s1 + $0x98] sm:$0xff] }
  0xb7   :  { %v276_v2 = vpop.permute.xlu0 %275  ;;  %v196_v4 = vpop.permute.xlu1 %195  ;;  %542 = vmatpush3.msra.mxu0 %v397_v61  ;;  %v64_v60 = vld [vmem:[%s937_s1 + $0x18] sm:$0xff] }
  0xb8   :  { %v347_v6 = vmul.f32 %v794_v34, %v276_v2  ;;  %v331_v7 = vmul.f32 %v794_v34, %v196_v4  ;;  %v412_v8 = vadd.f32 %v380_v0, %v85_v62  ;;  %v396_v9 = vadd.f32 %v364_v1, %v69_v63  ;;  %v111_v0 = vld [vmem:[#allocation6 + $0x90] sm:$0xff] }
  0xb9   :  { %v95_v2 = vld [vmem:[#allocation6 + $0x10] sm:$0xff] }
  0xba   :  { %v379_v12 = vmul.f32 %v347_v6, %v116_v3  ;;  %v363_v13 = vmul.f32 %v331_v7, %v100_v5  ;;  %543 = vmatprep.subr.mxu0 %v412_v8  ;;  %v79_v7 = vld [vmem:[%s937_s1 + $0x90] sm:$0xff] }
  0xbb   :  { %v271_v14 = vpop.permute.xlu0 %270  ;;  %v191_v16 = vpop.permute.xlu1 %190  ;;  %544 = vmatpush3.msra.mxu0 %v396_v9  ;;  %v63_v8 = vld [vmem:[%s937_s1 + $0x10] sm:$0xff] }
  0xbc   :  { %v346_v18 = vmul.f32 %v794_v34, %v271_v14  ;;  %v330_v19 = vmul.f32 %v794_v34, %v191_v16  ;;  %v411_v20 = vadd.f32 %v379_v12, %v84_v10  ;;  %v395_v21 = vadd.f32 %v363_v13, %v68_v11  ;;  %v110_v12 = vld [vmem:[#allocation6 + $0x88] sm:$0xff] }
  0xbd   :  { %v94_v14 = vld [vmem:[#allocation6 + $0x8] sm:$0xff] }
  0xbe   :  { %v378_v24 = vmul.f32 %v346_v18, %v115_v15  ;;  %v362_v25 = vmul.f32 %v330_v19, %v99_v17  ;;  %545 = vmatprep.subr.mxu0 %v411_v20  ;;  %v78_v19 = vld [vmem:[%s937_s1 + $0x88] sm:$0xff] }
  0xbf   :  { %v266_v26 = vpop.permute.xlu0 %265  ;;  %v186_v28 = vpop.permute.xlu1 %185  ;;  %546 = vmatpush3.msra.mxu0 %v395_v21  ;;  %v62_v20 = vld [vmem:[%s937_s1 + $0x8] sm:$0xff] }
  0xc0   :  { %v345_v30 = vmul.f32 %v794_v34, %v266_v26  ;;  %v329_v31 = vmul.f32 %v794_v34, %v186_v28  ;;  %v410_v32 = vadd.f32 %v378_v24, %v83_v22  ;;  %v394_v33 = vadd.f32 %v362_v25, %v67_v23  ;;  %v109_v24 = vld [vmem:[#allocation6 + $0x80] sm:$0xff] }
  0xc1   :  { %v93_v26 = vld [vmem:[#allocation6] sm:$0xff] }
  0xc2   :  { %v377_v37 = vmul.f32 %v345_v30, %v114_v27  ;;  %v361_v38 = vmul.f32 %v329_v31, %v98_v29  ;;  %547 = vmatprep.subr.mxu0 %v410_v32  ;;  %v77_v31 = vld [vmem:[%s937_s1 + $0x80] sm:$0xff] }
  0xc3   :  { %v261_v39 = vpop.permute.xlu0 %260  ;;  %v181_v41 = vpop.permute.xlu1 %180  ;;  %548 = vmatpush3.msra.mxu0 %v394_v33  ;;  %v61_v32 = vld [vmem:[%s937_s1] sm:$0xff] }
  0xc4   :  { %v344_v43 = vmul.f32 %v794_v34, %v261_v39  ;;  %v328_v44 = vmul.f32 %v794_v34, %v181_v41  ;;  %v409_v45 = vadd.f32 %v377_v37, %v82_v35  ;;  %v393_v46 = vadd.f32 %v361_v38, %v66_v36  ;;  %v421_v38 = vld [vmem:[#allocation3] sm:$0xff] }
  0xc5   :  { %v499_v39 = vld [vmem:[%s942_s6] sm:$0x1]  ;;  %s612_s6 = scalar_lea.vmem %s519_s25, 128 }
  0xc6   :  { %v376_v49 = vmul.f32 %v344_v43, %v113_v40  ;;  %v360_v50 = vmul.f32 %v328_v44, %v97_v42  ;;  %549 = vmatprep.subr.mxu0 %v409_v45  ;;  %v500_v40 = vld [vmem:[%s943_s7] sm:$0x1]  ;;  %p613_p10 = scmp.ne.s32.totalorder %s519_s25, %s612_s6  ;;  %p618_p12 = scmp.lt.s32.totalorder %s612_s6, %s612_s6 }
  0xc7   :  { %v256_v51 = vpop.permute.xlu0 %255  ;;  %v176_v53 = vpop.permute.xlu1 %175  ;;  %550 = vmatpush3.msra.mxu0 %v393_v46  ;;  %v501_v41 = vmul.f32 %v500_v40, %v499_v39  ;;  %v498_v43 = vld [vmem:[%s941_s5] sm:$0x1] }
  0xc8   :  { %v343_v55 = vmul.f32 %v794_v34, %v256_v51  ;;  %v327_v56 = vmul.f32 %v794_v34, %v176_v53  ;;  %v408_v57 = vadd.f32 %v376_v49, %v81_v47  ;;  %v392_v58 = vadd.f32 %v360_v50, %v65_v48  ;;  %p619_p13 = por %p618_p12, %p617_p11 }
  0xc9   :  { %v502_v44 = vadd.f32 %v501_v41, %v498_v43 }
  0xca   :  { %v375_v61 = vmul.f32 %v343_v55, %v112_v52  ;;  %v359_v62 = vmul.f32 %v327_v56, %v96_v54  ;;  %551 = vmatprep.subr.mxu0 %v408_v57  ;;  %p620_p0 = pnand %p619_p13, %p613_p10 }
  0xcb   :  { %v251_v63 = vpop.permute.xlu0 %250  ;;  %v171_v1 = vpop.permute.xlu1 %170  ;;  %552 = vmatpush3.msra.mxu0 %v392_v58 }
  0xcc   :  { %v342_v3 = vmul.f32 %v794_v34, %v251_v63  ;;  %v326_v4 = vmul.f32 %v794_v34, %v171_v1  ;;  %v407_v5 = vadd.f32 %v375_v61, %v80_v59  ;;  %v391_v6 = vadd.f32 %v359_v62, %v64_v60 }
  0xce   :  { %v374_v9 = vmul.f32 %v342_v3, %v111_v0  ;;  %v358_v10 = vmul.f32 %v326_v4, %v95_v2  ;;  %553 = vmatprep.subr.mxu0 %v407_v5 }
  0xcf   :  { %v246_v11 = vpop.permute.xlu0 %245  ;;  %v166_v13 = vpop.permute.xlu1 %165  ;;  %554 = vmatpush3.msra.mxu0 %v391_v6 }
  0xd0   :  { %v341_v15 = vmul.f32 %v794_v34, %v246_v11  ;;  %v325_v16 = vmul.f32 %v794_v34, %v166_v13  ;;  %v406_v17 = vadd.f32 %v374_v9, %v79_v7  ;;  %v390_v18 = vadd.f32 %v358_v10, %v63_v8 }
  0xd2   :  { %v373_v21 = vmul.f32 %v341_v15, %v110_v12  ;;  %v357_v22 = vmul.f32 %v325_v16, %v94_v14  ;;  %555 = vmatprep.subr.mxu0 %v406_v17 }
  0xd3   :  { %v241_v23 = vpop.permute.xlu0 %240  ;;  %v161_v25 = vpop.permute.xlu1 %160  ;;  %556 = vmatpush3.msra.mxu0 %v390_v18 }
  0xd4   :  { %v340_v27 = vmul.f32 %v794_v34, %v241_v23  ;;  %v324_v28 = vmul.f32 %v794_v34, %v161_v25  ;;  %v405_v29 = vadd.f32 %v373_v21, %v78_v19  ;;  %v389_v30 = vadd.f32 %v357_v22, %v62_v20 }
  0xd5   :  { %v505_v34 = vlaneseq }
  0xd6   :  { %v372_v33 = vmul.f32 %v340_v27, %v109_v24  ;;  %v356_v35 = vmul.f32 %v324_v28, %v93_v26  ;;  %557 = vmatprep.subr.mxu0 %v405_v29 }
  0xd7   :  { %558 = vmatpush3.msra.mxu0 %v389_v30  ;;  %v506_v42 = vshrl.u32 %v505_v34, 7 }
  0xd8   :  { %v404_v36 = vadd.f32 %v372_v33, %v77_v31  ;;  %v388_v37 = vadd.f32 %v356_v35, %v61_v32 }
  0xd9   :  { %v507_v45 = vsub.s32 0, %v506_v42 }
  0xda   :  { %559 = vmatprep.subr.mxu0 %v404_v36 }
  0xdb   :  { %560 = vmatpush3.msra.mxu0 %v388_v37  ;;  %v508_v47 = vrot.slane %v502_v44, %v507_v45 }
  0xdc   :  { %488 = vmatmul.mubr.f32.vlgmr.msra.gmra.mxu0 %v421_v38 }
 0x19c   :  { %v561_v46 = vpop.f32.mrf.mxu0 }
 0x19e   :  { %v562_v48 = vpop.f32.mrf.mxu0 }
 0x19f   :  { %v563_v49 = vadd.f32 %v562_v48, %v561_v46 }
 0x1a1   :  { %v510_v50 = vadd.f32 %v563_v49, %v508_v47 }
 0x1a3   :  { %511 = vst [vmem:[#allocation8] sm:$0xff] %v510_v50 }
 0x1a4   :  { %623 = shalt.err (!%p620_p0)
}
 0x1a5   :  { %521 = dma.vmem_to_hbm [thread:$0]  %s519_s25, 128, %s944_s8, [#allocation5]  }
 0x1a6   :  { %636 = dma.done.wait [#allocation5], 128  }
 0x1a7   :  { %637 = vsyncadd [#allocation5], 4294967168 }
 0x1a8   :  { %525 = vsyncpa [#allocation4], 1 }
 0x1a9   :  { %526 = vsyncpa [#allocation7], 1 }
 0x1aa   :  { %527 = vsyncpa [#allocation5], 1 }

</bundles_post_ra>
